<compile_context>
chip_gen: v5e
topology: v5e:2x2
jax: 0.10.0
libtpu: 0.0.40
codegen_flags: <defaults>
</compile_context>

<pallas_src>
import functools

import jax
import jax.numpy as jnp
from jax.experimental import pallas as pl
from jax.experimental.pallas import tpu as pltpu

_MIB = 1024 * 1024


def _round_up(v, m):
    return ((v + m - 1) // m) * m


def _vmem_capacity_bytes():
    try:
        return int(pltpu.get_tpu_info().vmem_capacity_bytes)
    except Exception:
        return 128 * _MIB  # conservative default (v5e/v6e-class)


def _gen_plan(F_in):
    """Generation-aware static plan shared by fuse_stack_weights and forward."""
    vmem_cap = _vmem_capacity_bytes()
    small_vmem = vmem_cap <= 64 * _MIB          # v7x-class TensorCore
    if small_vmem:
        tm_t, tn_t, tk_t = 256, 512, 512
        vmem_limit = min(int(vmem_cap * 3) // 4, 48 * _MIB)
    else:                                       # v5e / v6e: 128 MiB VMEM
        tm_t, tn_t, tk_t = 512, 1024, 1024
        vmem_limit = 112 * _MIB

    # Reduction tile: full F_in when it fits, else a 128-multiple chunk; the
    # reduction extent is padded (with zeros) to a tk multiple so no partial
    # K tiles are ever read.
    tk = F_in if F_in <= tk_t else tk_t
    F_in_pad = F_in if tk == F_in else _round_up(F_in, tk)
    return tm_t, tn_t, tk, F_in_pad, small_vmem, vmem_limit


def fuse_stack_weights(weights, biases, compute_dtype=None):
    """Pre-fuse (and pad) the ensemble weights ONCE, outside the hot path.

    weights: (K, F_in, F_out); biases: (K, F_out)
    returns: w_big (F_in_pad, N_pad) [compute_dtype], b_big (1, N_pad) [f32]
    where N_pad = round_up(K*F_out, 128) and F_in_pad = F_in padded to the
    reduction tile.  Pad regions are zero, so they contribute nothing.
    """
    K, F_in, F_out = weights.shape
    assert biases.shape == (K, F_out)
    N = K * F_out
    N_pad = _round_up(N, 128)
    _, _, _, F_in_pad, _, _ = _gen_plan(F_in)

    # W_big[:, k*F_out + j] = weights[k, :, j]
    w_big = jnp.transpose(weights, (1, 0, 2)).reshape(F_in, N)
    w_big = jnp.pad(w_big, ((0, F_in_pad - F_in), (0, N_pad - N)))
    b_big = jnp.pad(biases.reshape(1, N).astype(jnp.float32),
                    ((0, 0), (0, N_pad - N)))
    if compute_dtype is not None:
        w_big = w_big.astype(compute_dtype)
    return w_big, b_big


def _stack_kernel(x_ref, w_ref, b_ref, o_ref, acc_ref):
    # x_ref: (tm, tk)  batch x reduction tile
    # w_ref: (tk, tn)  fused-weight tile (columns of all K members)
    # b_ref: (1,  tn)  fused bias tile (f32)
    # o_ref: (tm, tn)  lane-dense output tile of the fused (B, N_pad)
    # acc_ref: (tm, tn) f32 VMEM accumulator, resident across the k axis
    k = pl.program_id(2)

    @pl.when(k == 0)
    def _():
        acc_ref[...] = jnp.zeros_like(acc_ref)

    acc_ref[...] += jnp.dot(x_ref[...], w_ref[...],
                            preferred_element_type=jnp.float32)

    @pl.when(k == pl.num_programs(2) - 1)
    def _():
        o_ref[...] = (acc_ref[...] + b_ref[...]).astype(o_ref.dtype)


@functools.partial(jax.jit, static_argnames=("K", "F_out", "compute_dtype"))
def stack_model_forward_fused(x, w_big, b_big, *, K, F_out, compute_dtype=None):
    """x: (B, F_in); w_big/b_big from fuse_stack_weights.
    Returns (B, K, F_out) == torch.stack([m(x) for m in models], dim=1)."""
    B, F_in = x.shape
    N = K * F_out
    N_pad = _round_up(N, 128)
    tm_t, tn_t, tk, F_in_pad, small_vmem, vmem_limit = _gen_plan(F_in)
    assert w_big.shape == (F_in_pad, N_pad) and b_big.shape == (1, N_pad)

    out_dtype = x.dtype
    if F_in_pad != F_in:
        x = jnp.pad(x, ((0, 0), (0, F_in_pad - F_in)))   # zeros: no contribution
    if compute_dtype is not None:
        x = x.astype(compute_dtype)
    in_itemsize = jnp.dtype(x.dtype).itemsize
    out_itemsize = jnp.dtype(out_dtype).itemsize

    # Batch / output-column tiles: full extent when small, else aligned targets.
    tm = B if B <= tm_t else tm_t               # tm_t is a multiple of 8
    tn = N_pad if N_pad <= tn_t else tn_t       # tn_t is a multiple of 128

    # v7x has 2 TensorCores: avoid a (1,1,*) grid when the problem is splittable.
    if small_vmem and B <= tm and N_pad <= tn:
        if N_pad >= 256 and N_pad % 256 == 0:
            tn = N_pad // 2
        elif B > 8:
            tm = _round_up(pl.cdiv(B, 2), 8)

    gi, gj, gk = pl.cdiv(B, tm), pl.cdiv(N_pad, tn), pl.cdiv(F_in_pad, tk)
    grid = (gi, gj, gk)

    # Advisory cost: includes the W re-fetch factor (W streamed once per batch
    # tile) and x re-streamed once per output-column tile.
    cost = pl.CostEstimate(
        flops=2 * B * F_in_pad * N_pad,
        transcendentals=0,
        bytes_accessed=(gj * B * F_in_pad * in_itemsize
                        + gi * F_in_pad * N_pad * in_itemsize
                        + N_pad * 4
                        + B * N_pad * out_itemsize),
    )

    y_flat = pl.pallas_call(
        _stack_kernel,
        out_shape=jax.ShapeDtypeStruct((B, N_pad), out_dtype),
        grid_spec=pltpu.PrefetchScalarGridSpec(
            num_scalar_prefetch=0,
            grid=grid,
            in_specs=[
                pl.BlockSpec((tm, tk), lambda i, j, k: (i, k)),   # x tile
                pl.BlockSpec((tk, tn), lambda i, j, k: (k, j)),   # fused W tile
                pl.BlockSpec((1, tn), lambda i, j, k: (0, j)),    # fused bias
            ],
            out_specs=pl.BlockSpec((tm, tn), lambda i, j, k: (i, j)),
            scratch_shapes=[pltpu.VMEM((tm, tn), jnp.float32)],
        ),
        compiler_params=pltpu.CompilerParams(
            dimension_semantics=("parallel", "parallel", "arbitrary"),
            vmem_limit_bytes=vmem_limit,
        ),
        cost_estimate=cost,
    )(x, w_big, b_big)

    # Drop the lane padding and un-fuse the stack dim (layout plumbing only).
    return y_flat[:, :N].reshape(B, K, F_out)


def stack_model_forward(x, weights, biases, compute_dtype=None):
    """Convenience one-shot path (fuses weights per call; prefer pre-fusing)."""
    K, _, F_out = weights.shape
    w_big, b_big = fuse_stack_weights(weights, biases, compute_dtype)
    return stack_model_forward_fused(x, w_big, b_big, K=K, F_out=F_out,
                                     compute_dtype=compute_dtype)


if __name__ == "__main__":
    # Small deterministic setup: batch=8, in_features=32, out_features=16,
    # ensemble of K=4 linear members.
    B, F_IN, F_OUT, K = 8, 32, 16, 4

    key = jax.random.PRNGKey(0)
    kx, kw, kb = jax.random.split(key, 3)

    x = jax.random.normal(kx, (B, F_IN), dtype=jnp.float32)
    weights = jax.random.normal(kw, (K, F_IN, F_OUT), dtype=jnp.float32) * 0.1
    biases = jax.random.normal(kb, (K, F_OUT), dtype=jnp.float32) * 0.01

    # Fuse + pad the static ensemble weights ONCE (outside the hot path).
    w_big, b_big = fuse_stack_weights(weights, biases)

    y = stack_model_forward_fused(x, w_big, b_big, K=K, F_out=F_OUT)
    y = jax.block_until_ready(y)

    # Pure-JAX reference of StackModel semantics (no_grad/detach are no-ops):
    # stack each member's forward along dim=1.
    ref = jnp.stack([x @ weights[k] + biases[k] for k in range(K)], axis=1)
    assert y.shape == (B, K, F_OUT)
    assert jnp.allclose(y, ref, atol=1e-5, rtol=1e-5)

    print("KERNEL_OK")
</pallas_src>

<mosaic_0001>
module attributes {stable_mosaic.version = 11 : i64} {
  func.func @_stack_kernel(%arg0: i32, %arg1: i32, %arg2: i32, %arg3: memref<8x32xf32, #tpu.memory_space<vmem>>, %arg4: memref<32x128xf32, #tpu.memory_space<vmem>>, %arg5: memref<1x128xf32, #tpu.memory_space<vmem>>, %arg6: memref<8x128xf32, #tpu.memory_space<vmem>>, %arg7: memref<8x128xf32, #tpu.memory_space<vmem>>) attributes {dimension_semantics = [#tpu.dimension_semantics<parallel>, #tpu.dimension_semantics<parallel>, #tpu.dimension_semantics<arbitrary>], iteration_bounds = array<i64: 1, 1, 1>, scalar_prefetch = 0 : i64, scratch_operands = 1 : i64, tpu.core_type = #tpu.core_type<tc>, window_params = [{transform_indices = @transform_0, window_bounds = array<i64: 8, 32>}, {transform_indices = @transform_1, window_bounds = array<i64: 32, 128>}, {transform_indices = @transform_2, window_bounds = array<i64: 1, 128>}, {transform_indices = @transform_3, window_bounds = array<i64: 8, 128>}]} {
    %c0_i32 = arith.constant 0 : i32
    %0 = arith.cmpi eq, %arg2, %c0_i32 : i32
    %1 = arith.extui %0 : i1 to i32
    %c0_i32_0 = arith.constant 0 : i32
    %2 = arith.cmpi ne, %1, %c0_i32_0 : i32
    scf.if %2 {
      %cst_10 = arith.constant 0.000000e+00 : f32
      %12 = vector.broadcast %cst_10 : f32 to vector<8x128xf32>
      %c0_11 = arith.constant 0 : index
      %c0_12 = arith.constant 0 : index
      %13 = vector.load %arg7[%c0_11, %c0_12] : memref<8x128xf32, #tpu.memory_space<vmem>>, vector<8x128xf32>
      tpu.vector_store %arg7[%c0_11, %c0_12], %12 {strides = array<i32>} : memref<8x128xf32, #tpu.memory_space<vmem>>, vector<8x128xf32>,
    } else {
    }
    %c0 = arith.constant 0 : index
    %c0_1 = arith.constant 0 : index
    %3 = vector.load %arg7[%c0, %c0_1] : memref<8x128xf32, #tpu.memory_space<vmem>>, vector<8x128xf32>
    %c0_2 = arith.constant 0 : index
    %c0_3 = arith.constant 0 : index
    %4 = vector.load %arg3[%c0_2, %c0_3] : memref<8x32xf32, #tpu.memory_space<vmem>>, vector<8x32xf32>
    %c0_4 = arith.constant 0 : index
    %c0_5 = arith.constant 0 : index
    %5 = vector.load %arg4[%c0_4, %c0_5] : memref<32x128xf32, #tpu.memory_space<vmem>>, vector<32x128xf32>
    %cst = arith.constant dense<0.000000e+00> : vector<8x128xf32>
    %6 = tpu.matmul %4, %5, %cst {dimension_numbers = #tpu.dot_dimension_numbers<[1], [0], [0], [1], [0, 0, 1, 1], [], []>} : vector<8x32xf32>, vector<32x128xf32>, vector<8x128xf32> -> vector<8x128xf32>
    %7 = arith.addf %3, %6 : vector<8x128xf32>
    %c0_6 = arith.constant 0 : index
    %c0_7 = arith.constant 0 : index
    %8 = vector.load %arg7[%c0_6, %c0_7] : memref<8x128xf32, #tpu.memory_space<vmem>>, vector<8x128xf32>
    tpu.vector_store %arg7[%c0_6, %c0_7], %7 {strides = array<i32>} : memref<8x128xf32, #tpu.memory_space<vmem>>, vector<8x128xf32>,
    %c0_i32_8 = arith.constant 0 : i32
    %9 = arith.cmpi eq, %arg2, %c0_i32_8 : i32
    %10 = arith.extui %9 : i1 to i32
    %c0_i32_9 = arith.constant 0 : i32
    %11 = arith.cmpi ne, %10, %c0_i32_9 : i32
    scf.if %11 {
      %c0_10 = arith.constant 0 : index
      %c0_11 = arith.constant 0 : index
      %12 = vector.load %arg7[%c0_10, %c0_11] : memref<8x128xf32, #tpu.memory_space<vmem>>, vector<8x128xf32>
      %c0_12 = arith.constant 0 : index
      %c0_13 = arith.constant 0 : index
      %13 = vector.load %arg5[%c0_12, %c0_13] : memref<1x128xf32, #tpu.memory_space<vmem>>, vector<1x128xf32>
      %14 = vector.broadcast %13 : vector<1x128xf32> to vector<8x128xf32>
      %15 = arith.addf %12, %14 : vector<8x128xf32>
      %c0_14 = arith.constant 0 : index
      %c0_15 = arith.constant 0 : index
      %16 = vector.load %arg6[%c0_14, %c0_15] : memref<8x128xf32, #tpu.memory_space<vmem>>, vector<8x128xf32>
      tpu.vector_store %arg6[%c0_14, %c0_15], %15 {strides = array<i32>} : memref<8x128xf32, #tpu.memory_space<vmem>>, vector<8x128xf32>,
    } else {
    }
    return
  }
  func.func @transform_0(%arg0: i32, %arg1: i32, %arg2: i32) -> (i32, i32) {
    %c0_i32 = arith.constant 0 : i32
    return %arg0, %arg2 : i32, i32
  }
  func.func @transform_1(%arg0: i32, %arg1: i32, %arg2: i32) -> (i32, i32) {
    %c0_i32 = arith.constant 0 : i32
    return %arg2, %arg1 : i32, i32
  }
  func.func @transform_2(%arg0: i32, %arg1: i32, %arg2: i32) -> (i32, i32) {
    %c0_i32 = arith.constant 0 : i32
    %c0_i32_0 = arith.constant 0 : i32
    return %c0_i32, %arg1 : i32, i32
  }
  func.func @transform_3(%arg0: i32, %arg1: i32, %arg2: i32) -> (i32, i32) {
    %c0_i32 = arith.constant 0 : i32
    return %arg0, %arg1 : i32, i32
  }
}

</mosaic_0001>

<bundles_post_ra>
// kernel: stack_model_forward_fused.1
= control target key start
LH: loop header
LB: loop body
LE: loop exit
PB: predicated region body
PF: predicated region fallthrough
CT: control target
= control target key end

     0   :  { %8 = vsyncpa [#allocation4], 0  ;;  %s191_s0 = inlined_call_operand.hbm [shape: f32[8,32], index: 0, kind: input, shape index: {}]   ;;  %s192_s1 = inlined_call_operand.hbm [shape: f32[32,128], index: 1, kind: input, shape index: {}]   ;;  %s193_s2 = inlined_call_operand.vmem [shape: f32[1,128], index: 2, kind: input, shape index: {}]   ;;  %s194_s3 = inlined_call_operand.vmem [shape: f32[8,128], index: 3, kind: output, shape index: {}]  }
   0x1   :  { %s15_s14 = sshll.u32 %s191_s0, 4  ;;  %s16_s14 = int_to_ptr.hbm [resolvable:$true] %s15_s14 }
   0x2   :  { %9 = vsyncpa [#allocation6], 0  ;;  %s155_s15 = smov [#allocation3]   ;;  %s25_s19 = sshll.u32 %s192_s1, 4  ;;  %s26_s19 = int_to_ptr.hbm [resolvable:$true] %s25_s19 }
   0x3   :  { %s17_s16 = sshll.u32 %s155_s15, 4  ;;  %s156_s20 = smov [#allocation5]   ;;  %s18_s16 = int_to_ptr.vmem [resolvable:$true] %s17_s16 }
   0x4   :  { %20 = dma.hbm_to_vmem [thread:$0]  %s16_s14, 128, %s18_s16, [#allocation4]  }
   0x5   :  { %s27_s21 = sshll.u32 %s156_s20, 4  ;;  %s157_s22 = smov 128   ;;  %s28_s21 = int_to_ptr.vmem [resolvable:$true] %s27_s21 }
   0x6   :  { %s158_s23 = smov 8  }
   0x7   :  { %33 = dma.hbm_to_vmem [thread:$0]  %s26_s19, 512, %s28_s21, [#allocation6], %s157_s22, %s157_s22, %s158_s23  }
   0x8   :  { %151 = dma.done.wait [#allocation4], 128  }
   0x9   :  { %152 = vsyncadd [#allocation4], 4294967168 }
   0xa   :  { %153 = dma.done.wait [#allocation6], 512  }
   0xb   :  { %154 = vsyncadd [#allocation6], 4294966784  ;;  %v54_v0 = vld [vmem:[#allocation5 + $0x18] sm:$0xff]  ;;  %v53_v1 = vld [vmem:[#allocation5 + $0x10] sm:$0xff]  ;;  %vm55_vm0 = vcmask 261120  }
   0xc   :  { %71 = vmatpush.msra.mxu0 %v54_v0  ;;  %v52_v2 = vld [vmem:[#allocation5 + $0x8] sm:$0xff]  ;;  %v51_v3 = vld [vmem:[#allocation5] sm:$0xff]  ;;  %v50_v4 = vld [vmem:[#allocation3] sm:$0xff] }
   0xd   :  { %v102_v5 = vld [vmem:[%s193_s2] ss:$0 sm:$0xff] }
   0xe   :  { %72 = vmatpush.msra.mxu0 %v53_v1 }
  0x10   :  { %73 = vmatpush.msra.mxu0 %v52_v2 }
  0x12   :  { %74 = vmatpush.msra.mxu0 %v51_v3 }
  0x13   :  { %97 = vmatmul.msk.f32.vlgmr.msra.gmra.mxu0 %vm55_vm0, %v50_v4 }
  0x90   :  { %v76_v6 = vpop.f32.mrf.mxu0 }
  0x91   :  { %v89_v7 = vadd.f32 %v102_v5, %v76_v6 }
  0x93   :  { %90 = vst [vmem:[%s194_s3] sm:$0xff] %v89_v7 }
  0x94   :  { %95 = vsyncpa [#allocation4], 1 }
  0x95   :  { %96 = vsyncpa [#allocation6], 1 }

</bundles_post_ra>
